<compile_context>
chip_gen: v7x
topology: tpu7x:2x2x1
jax: 0.10.0
libtpu: 0.0.40
codegen_flags: <defaults>
</compile_context>

<pallas_src>
import jax
import jax.numpy as jnp
from jax.experimental import pallas as pl
from jax.experimental.pallas import tpu as pltpu


def _fls_kernel(xT_ref, a_ref, inv_ba_ref, d_ref, inv_dc_ref, h_ref, o_ref):
    # xT_ref    : (X, TB)  crisp inputs, transposed: batch on lanes (lane-dense)
    # a, inv_ba : (R, X)   left corner / 1/(b-a)
    # d, inv_dc : (R, X)   right corner / 1/(d-c)
    # h_ref     : (R, 1)   rule heights (consequents)
    # o_ref     : (1, TB)  defuzzified output row (lane-dense store)
    xT = xT_ref[...]                                   # (X, TB)
    a = a_ref[...]                                     # (R, X)
    inv_ba = inv_ba_ref[...]
    d = d_ref[...]
    inv_dc = inv_dc_ref[...]
    h = h_ref[...]                                     # (R, 1)

    X = a.shape[1]

    def dim_mu(k):
        x_k = xT[k:k + 1, :]                           # (1, TB)
        rise = (x_k - a[:, k:k + 1]) * inv_ba[:, k:k + 1]   # (R, TB)
        fall = (d[:, k:k + 1] - x_k) * inv_dc[:, k:k + 1]   # (R, TB)
        return jnp.clip(jnp.minimum(rise, fall), 0.0, 1.0)

    # product T-norm across input dims, fully lane-dense (pure VALU muls)
    firing = dim_mu(0)                                 # (R, TB)
    for k in range(1, X):
        firing = firing * dim_mu(k)

    # height defuzzification: two sublane reductions (no MXU, no masked stores)
    num = jnp.sum(firing * h, axis=0, keepdims=True)   # (1, TB)
    den = jnp.sum(firing, axis=0, keepdims=True)       # (1, TB)
    o_ref[...] = num / (den + 1e-12)                   # exact divide (tolerance)


def strictly_trap_fls(x, a, b, c, d, heights, *, tb=512):
    """x: (B, X) f32 -> (B, 1) f32."""
    B, X = x.shape
    R = a.shape[0]

    # Hoist loop-invariant reciprocals out of the kernel. Floor the widths so
    # degenerate (trained) params can never produce inf/NaN before the clip.
    inv_ba = 1.0 / jnp.maximum(b - a, 1e-30)
    inv_dc = 1.0 / jnp.maximum(d - c, 1e-30)

    # Lane-dense batch tiling: tile width is a multiple of 128 lanes.
    tb_eff = min(tb, int(pl.cdiv(B, 128)) * 128)
    Bp = int(pl.cdiv(B, tb_eff)) * tb_eff
    G = Bp // tb_eff

    # Batch on the last (lane) axis; zero-pad to the tiled extent.
    xT = jnp.pad(x.T.astype(jnp.float32), ((0, 0), (0, Bp - B)))   # (X, Bp)

    out = pl.pallas_call(
        _fls_kernel,
        out_shape=jax.ShapeDtypeStruct((1, Bp), jnp.float32),
        grid_spec=pltpu.PrefetchScalarGridSpec(
            num_scalar_prefetch=0,
            grid=(G,),
            in_specs=[
                pl.BlockSpec((X, tb_eff), lambda i: (0, i)),  # x (batch-tiled)
                pl.BlockSpec((R, X), lambda i: (0, 0)),       # a      (resident)
                pl.BlockSpec((R, X), lambda i: (0, 0)),       # 1/(b-a)
                pl.BlockSpec((R, X), lambda i: (0, 0)),       # d
                pl.BlockSpec((R, X), lambda i: (0, 0)),       # 1/(d-c)
                pl.BlockSpec((R, 1), lambda i: (0, 0)),       # heights
            ],
            out_specs=pl.BlockSpec((1, tb_eff), lambda i: (0, i)),
        ),
        compiler_params=pltpu.CompilerParams(
            dimension_semantics=("parallel",)),
    )(xT, a, inv_ba, d, inv_dc, heights)

    return out.reshape(Bp, 1)[:B]


def init_params(xDim, rule_num, yDim=1):
    """Deterministic parameter construction (glue, plain JAX).

    Strict ordering a < b <= c < d enforced via positive increments
    (softplus reparameterization), mirroring a 'strictly' trapezoidal layer.
    """
    k = jax.random.PRNGKey(42)
    ka, k1, k2, k3, kh = jax.random.split(k, 5)
    a_raw = jax.random.normal(ka, (rule_num, xDim), jnp.float32)
    d1 = jax.random.normal(k1, (rule_num, xDim), jnp.float32)
    d2 = jax.random.normal(k2, (rule_num, xDim), jnp.float32)
    d3 = jax.random.normal(k3, (rule_num, xDim), jnp.float32)
    sp = jax.nn.softplus
    a = a_raw
    b = a + sp(d1) + 1e-3
    c = b + sp(d2)
    d = c + sp(d3) + 1e-3
    heights = jax.random.normal(kh, (rule_num, yDim), jnp.float32)
    return a, b, c, d, heights


if __name__ == "__main__":
    batch, xDim, rule_num = 8, 8, 16
    key = jax.random.PRNGKey(0)
    x = jax.random.normal(key, (batch, xDim), jnp.float32)

    a, b, c, d, heights = init_params(xDim, rule_num)

    y = strictly_trap_fls(x, a, b, c, d, heights)
    y = jax.block_until_ready(y)

    # reference check in plain JAX
    mu = jnp.clip(
        jnp.minimum((x[:, None, :] - a) / (b - a), (d - x[:, None, :]) / (d - c)),
        0.0, 1.0)
    firing = jnp.prod(mu, axis=-1)
    y_ref = (firing @ heights) / (jnp.sum(firing, axis=-1, keepdims=True) + 1e-12)
    assert y.shape == (batch, 1)
    assert jnp.allclose(y, y_ref, atol=1e-5, rtol=1e-5)

    print("KERNEL_OK")
</pallas_src>

<mosaic_0001>
module attributes {stable_mosaic.version = 11 : i64} {
  func.func @_fls_kernel(%arg0: i32, %arg1: memref<8x128xf32, #tpu.memory_space<vmem>>, %arg2: memref<16x8xf32, #tpu.memory_space<vmem>>, %arg3: memref<16x8xf32, #tpu.memory_space<vmem>>, %arg4: memref<16x8xf32, #tpu.memory_space<vmem>>, %arg5: memref<16x8xf32, #tpu.memory_space<vmem>>, %arg6: memref<16x1xf32, #tpu.memory_space<vmem>>, %arg7: memref<1x128xf32, #tpu.memory_space<vmem>>) attributes {dimension_semantics = [#tpu.dimension_semantics<parallel>], iteration_bounds = array<i64: 1>, scalar_prefetch = 0 : i64, scratch_operands = 0 : i64, tpu.core_type = #tpu.core_type<tc>, window_params = [{transform_indices = @transform_0, window_bounds = array<i64: 8, 128>}, {pipeline_mode = #tpu.pipeline_mode<synchronous>, transform_indices = @transform_1, window_bounds = array<i64: 16, 8>}, {pipeline_mode = #tpu.pipeline_mode<synchronous>, transform_indices = @transform_2, window_bounds = array<i64: 16, 8>}, {pipeline_mode = #tpu.pipeline_mode<synchronous>, transform_indices = @transform_3, window_bounds = array<i64: 16, 8>}, {pipeline_mode = #tpu.pipeline_mode<synchronous>, transform_indices = @transform_4, window_bounds = array<i64: 16, 8>}, {pipeline_mode = #tpu.pipeline_mode<synchronous>, transform_indices = @transform_5, window_bounds = array<i64: 16, 1>}, {transform_indices = @transform_6, window_bounds = array<i64: 1, 128>}]} {
    %c0 = arith.constant 0 : index
    %c0_0 = arith.constant 0 : index
    %0 = vector.load %arg1[%c0, %c0_0] : memref<8x128xf32, #tpu.memory_space<vmem>>, vector<8x128xf32>
    %c0_1 = arith.constant 0 : index
    %c0_2 = arith.constant 0 : index
    %1 = vector.load %arg2[%c0_1, %c0_2] : memref<16x8xf32, #tpu.memory_space<vmem>>, vector<16x8xf32>
    %c0_3 = arith.constant 0 : index
    %c0_4 = arith.constant 0 : index
    %2 = vector.load %arg3[%c0_3, %c0_4] : memref<16x8xf32, #tpu.memory_space<vmem>>, vector<16x8xf32>
    %c0_5 = arith.constant 0 : index
    %c0_6 = arith.constant 0 : index
    %3 = vector.load %arg4[%c0_5, %c0_6] : memref<16x8xf32, #tpu.memory_space<vmem>>, vector<16x8xf32>
    %c0_7 = arith.constant 0 : index
    %c0_8 = arith.constant 0 : index
    %4 = vector.load %arg5[%c0_7, %c0_8] : memref<16x8xf32, #tpu.memory_space<vmem>>, vector<16x8xf32>
    %c0_9 = arith.constant 0 : index
    %c0_10 = arith.constant 0 : index
    %5 = vector.load %arg6[%c0_9, %c0_10] : memref<16x1xf32, #tpu.memory_space<vmem>>, vector<16x1xf32>
    %6 = vector.extract_strided_slice %0 {offsets = [0, 0], sizes = [1, 128], strides = [1, 1]} : vector<8x128xf32> to vector<1x128xf32>
    %7 = vector.extract_strided_slice %1 {offsets = [0, 0], sizes = [16, 1], strides = [1, 1]} : vector<16x8xf32> to vector<16x1xf32>
    %8 = vector.broadcast %6 : vector<1x128xf32> to vector<16x128xf32>
    %9 = vector.broadcast %7 : vector<16x1xf32> to vector<16x128xf32>
    %10 = arith.subf %8, %9 : vector<16x128xf32>
    %11 = vector.extract_strided_slice %2 {offsets = [0, 0], sizes = [16, 1], strides = [1, 1]} : vector<16x8xf32> to vector<16x1xf32>
    %12 = vector.broadcast %11 : vector<16x1xf32> to vector<16x128xf32>
    %13 = arith.mulf %10, %12 : vector<16x128xf32>
    %14 = vector.extract_strided_slice %3 {offsets = [0, 0], sizes = [16, 1], strides = [1, 1]} : vector<16x8xf32> to vector<16x1xf32>
    %15 = vector.broadcast %14 : vector<16x1xf32> to vector<16x128xf32>
    %16 = vector.broadcast %6 : vector<1x128xf32> to vector<16x128xf32>
    %17 = arith.subf %15, %16 : vector<16x128xf32>
    %18 = vector.extract_strided_slice %4 {offsets = [0, 0], sizes = [16, 1], strides = [1, 1]} : vector<16x8xf32> to vector<16x1xf32>
    %19 = vector.broadcast %18 : vector<16x1xf32> to vector<16x128xf32>
    %20 = arith.mulf %17, %19 : vector<16x128xf32>
    %21 = arith.minimumf %13, %20 : vector<16x128xf32>
    %cst = arith.constant 0.000000e+00 : f32
    %cst_11 = arith.constant 1.000000e+00 : f32
    %22 = vector.broadcast %cst : f32 to vector<16x128xf32>
    %23 = arith.maximumf %22, %21 : vector<16x128xf32>
    %24 = vector.broadcast %cst_11 : f32 to vector<16x128xf32>
    %25 = arith.minimumf %24, %23 : vector<16x128xf32>
    %26 = vector.extract_strided_slice %0 {offsets = [1, 0], sizes = [1, 128], strides = [1, 1]} : vector<8x128xf32> to vector<1x128xf32>
    %27 = vector.extract_strided_slice %1 {offsets = [0, 1], sizes = [16, 1], strides = [1, 1]} : vector<16x8xf32> to vector<16x1xf32>
    %28 = vector.broadcast %26 : vector<1x128xf32> to vector<16x128xf32>
    %29 = vector.broadcast %27 : vector<16x1xf32> to vector<16x128xf32>
    %30 = arith.subf %28, %29 : vector<16x128xf32>
    %31 = vector.extract_strided_slice %2 {offsets = [0, 1], sizes = [16, 1], strides = [1, 1]} : vector<16x8xf32> to vector<16x1xf32>
    %32 = vector.broadcast %31 : vector<16x1xf32> to vector<16x128xf32>
    %33 = arith.mulf %30, %32 : vector<16x128xf32>
    %34 = vector.extract_strided_slice %3 {offsets = [0, 1], sizes = [16, 1], strides = [1, 1]} : vector<16x8xf32> to vector<16x1xf32>
    %35 = vector.broadcast %34 : vector<16x1xf32> to vector<16x128xf32>
    %36 = vector.broadcast %26 : vector<1x128xf32> to vector<16x128xf32>
    %37 = arith.subf %35, %36 : vector<16x128xf32>
    %38 = vector.extract_strided_slice %4 {offsets = [0, 1], sizes = [16, 1], strides = [1, 1]} : vector<16x8xf32> to vector<16x1xf32>
    %39 = vector.broadcast %38 : vector<16x1xf32> to vector<16x128xf32>
    %40 = arith.mulf %37, %39 : vector<16x128xf32>
    %41 = arith.minimumf %33, %40 : vector<16x128xf32>
    %cst_12 = arith.constant 0.000000e+00 : f32
    %cst_13 = arith.constant 1.000000e+00 : f32
    %42 = vector.broadcast %cst_12 : f32 to vector<16x128xf32>
    %43 = arith.maximumf %42, %41 : vector<16x128xf32>
    %44 = vector.broadcast %cst_13 : f32 to vector<16x128xf32>
    %45 = arith.minimumf %44, %43 : vector<16x128xf32>
    %46 = arith.mulf %25, %45 : vector<16x128xf32>
    %47 = vector.extract_strided_slice %0 {offsets = [2, 0], sizes = [1, 128], strides = [1, 1]} : vector<8x128xf32> to vector<1x128xf32>
    %48 = vector.extract_strided_slice %1 {offsets = [0, 2], sizes = [16, 1], strides = [1, 1]} : vector<16x8xf32> to vector<16x1xf32>
    %49 = vector.broadcast %47 : vector<1x128xf32> to vector<16x128xf32>
    %50 = vector.broadcast %48 : vector<16x1xf32> to vector<16x128xf32>
    %51 = arith.subf %49, %50 : vector<16x128xf32>
    %52 = vector.extract_strided_slice %2 {offsets = [0, 2], sizes = [16, 1], strides = [1, 1]} : vector<16x8xf32> to vector<16x1xf32>
    %53 = vector.broadcast %52 : vector<16x1xf32> to vector<16x128xf32>
    %54 = arith.mulf %51, %53 : vector<16x128xf32>
    %55 = vector.extract_strided_slice %3 {offsets = [0, 2], sizes = [16, 1], strides = [1, 1]} : vector<16x8xf32> to vector<16x1xf32>
    %56 = vector.broadcast %55 : vector<16x1xf32> to vector<16x128xf32>
    %57 = vector.broadcast %47 : vector<1x128xf32> to vector<16x128xf32>
    %58 = arith.subf %56, %57 : vector<16x128xf32>
    %59 = vector.extract_strided_slice %4 {offsets = [0, 2], sizes = [16, 1], strides = [1, 1]} : vector<16x8xf32> to vector<16x1xf32>
    %60 = vector.broadcast %59 : vector<16x1xf32> to vector<16x128xf32>
    %61 = arith.mulf %58, %60 : vector<16x128xf32>
    %62 = arith.minimumf %54, %61 : vector<16x128xf32>
    %cst_14 = arith.constant 0.000000e+00 : f32
    %cst_15 = arith.constant 1.000000e+00 : f32
    %63 = vector.broadcast %cst_14 : f32 to vector<16x128xf32>
    %64 = arith.maximumf %63, %62 : vector<16x128xf32>
    %65 = vector.broadcast %cst_15 : f32 to vector<16x128xf32>
    %66 = arith.minimumf %65, %64 : vector<16x128xf32>
    %67 = arith.mulf %46, %66 : vector<16x128xf32>
    %68 = vector.extract_strided_slice %0 {offsets = [3, 0], sizes = [1, 128], strides = [1, 1]} : vector<8x128xf32> to vector<1x128xf32>
    %69 = vector.extract_strided_slice %1 {offsets = [0, 3], sizes = [16, 1], strides = [1, 1]} : vector<16x8xf32> to vector<16x1xf32>
    %70 = vector.broadcast %68 : vector<1x128xf32> to vector<16x128xf32>
    %71 = vector.broadcast %69 : vector<16x1xf32> to vector<16x128xf32>
    %72 = arith.subf %70, %71 : vector<16x128xf32>
    %73 = vector.extract_strided_slice %2 {offsets = [0, 3], sizes = [16, 1], strides = [1, 1]} : vector<16x8xf32> to vector<16x1xf32>
    %74 = vector.broadcast %73 : vector<16x1xf32> to vector<16x128xf32>
    %75 = arith.mulf %72, %74 : vector<16x128xf32>
    %76 = vector.extract_strided_slice %3 {offsets = [0, 3], sizes = [16, 1], strides = [1, 1]} : vector<16x8xf32> to vector<16x1xf32>
    %77 = vector.broadcast %76 : vector<16x1xf32> to vector<16x128xf32>
    %78 = vector.broadcast %68 : vector<1x128xf32> to vector<16x128xf32>
    %79 = arith.subf %77, %78 : vector<16x128xf32>
    %80 = vector.extract_strided_slice %4 {offsets = [0, 3], sizes = [16, 1], strides = [1, 1]} : vector<16x8xf32> to vector<16x1xf32>
    %81 = vector.broadcast %80 : vector<16x1xf32> to vector<16x128xf32>
    %82 = arith.mulf %79, %81 : vector<16x128xf32>
    %83 = arith.minimumf %75, %82 : vector<16x128xf32>
    %cst_16 = arith.constant 0.000000e+00 : f32
    %cst_17 = arith.constant 1.000000e+00 : f32
    %84 = vector.broadcast %cst_16 : f32 to vector<16x128xf32>
    %85 = arith.maximumf %84, %83 : vector<16x128xf32>
    %86 = vector.broadcast %cst_17 : f32 to vector<16x128xf32>
    %87 = arith.minimumf %86, %85 : vector<16x128xf32>
    %88 = arith.mulf %67, %87 : vector<16x128xf32>
    %89 = vector.extract_strided_slice %0 {offsets = [4, 0], sizes = [1, 128], strides = [1, 1]} : vector<8x128xf32> to vector<1x128xf32>
    %90 = vector.extract_strided_slice %1 {offsets = [0, 4], sizes = [16, 1], strides = [1, 1]} : vector<16x8xf32> to vector<16x1xf32>
    %91 = vector.broadcast %89 : vector<1x128xf32> to vector<16x128xf32>
    %92 = vector.broadcast %90 : vector<16x1xf32> to vector<16x128xf32>
    %93 = arith.subf %91, %92 : vector<16x128xf32>
    %94 = vector.extract_strided_slice %2 {offsets = [0, 4], sizes = [16, 1], strides = [1, 1]} : vector<16x8xf32> to vector<16x1xf32>
    %95 = vector.broadcast %94 : vector<16x1xf32> to vector<16x128xf32>
    %96 = arith.mulf %93, %95 : vector<16x128xf32>
    %97 = vector.extract_strided_slice %3 {offsets = [0, 4], sizes = [16, 1], strides = [1, 1]} : vector<16x8xf32> to vector<16x1xf32>
    %98 = vector.broadcast %97 : vector<16x1xf32> to vector<16x128xf32>
    %99 = vector.broadcast %89 : vector<1x128xf32> to vector<16x128xf32>
    %100 = arith.subf %98, %99 : vector<16x128xf32>
    %101 = vector.extract_strided_slice %4 {offsets = [0, 4], sizes = [16, 1], strides = [1, 1]} : vector<16x8xf32> to vector<16x1xf32>
    %102 = vector.broadcast %101 : vector<16x1xf32> to vector<16x128xf32>
    %103 = arith.mulf %100, %102 : vector<16x128xf32>
    %104 = arith.minimumf %96, %103 : vector<16x128xf32>
    %cst_18 = arith.constant 0.000000e+00 : f32
    %cst_19 = arith.constant 1.000000e+00 : f32
    %105 = vector.broadcast %cst_18 : f32 to vector<16x128xf32>
    %106 = arith.maximumf %105, %104 : vector<16x128xf32>
    %107 = vector.broadcast %cst_19 : f32 to vector<16x128xf32>
    %108 = arith.minimumf %107, %106 : vector<16x128xf32>
    %109 = arith.mulf %88, %108 : vector<16x128xf32>
    %110 = vector.extract_strided_slice %0 {offsets = [5, 0], sizes = [1, 128], strides = [1, 1]} : vector<8x128xf32> to vector<1x128xf32>
    %111 = vector.extract_strided_slice %1 {offsets = [0, 5], sizes = [16, 1], strides = [1, 1]} : vector<16x8xf32> to vector<16x1xf32>
    %112 = vector.broadcast %110 : vector<1x128xf32> to vector<16x128xf32>
    %113 = vector.broadcast %111 : vector<16x1xf32> to vector<16x128xf32>
    %114 = arith.subf %112, %113 : vector<16x128xf32>
    %115 = vector.extract_strided_slice %2 {offsets = [0, 5], sizes = [16, 1], strides = [1, 1]} : vector<16x8xf32> to vector<16x1xf32>
    %116 = vector.broadcast %115 : vector<16x1xf32> to vector<16x128xf32>
    %117 = arith.mulf %114, %116 : vector<16x128xf32>
    %118 = vector.extract_strided_slice %3 {offsets = [0, 5], sizes = [16, 1], strides = [1, 1]} : vector<16x8xf32> to vector<16x1xf32>
    %119 = vector.broadcast %118 : vector<16x1xf32> to vector<16x128xf32>
    %120 = vector.broadcast %110 : vector<1x128xf32> to vector<16x128xf32>
    %121 = arith.subf %119, %120 : vector<16x128xf32>
    %122 = vector.extract_strided_slice %4 {offsets = [0, 5], sizes = [16, 1], strides = [1, 1]} : vector<16x8xf32> to vector<16x1xf32>
    %123 = vector.broadcast %122 : vector<16x1xf32> to vector<16x128xf32>
    %124 = arith.mulf %121, %123 : vector<16x128xf32>
    %125 = arith.minimumf %117, %124 : vector<16x128xf32>
    %cst_20 = arith.constant 0.000000e+00 : f32
    %cst_21 = arith.constant 1.000000e+00 : f32
    %126 = vector.broadcast %cst_20 : f32 to vector<16x128xf32>
    %127 = arith.maximumf %126, %125 : vector<16x128xf32>
    %128 = vector.broadcast %cst_21 : f32 to vector<16x128xf32>
    %129 = arith.minimumf %128, %127 : vector<16x128xf32>
    %130 = arith.mulf %109, %129 : vector<16x128xf32>
    %131 = vector.extract_strided_slice %0 {offsets = [6, 0], sizes = [1, 128], strides = [1, 1]} : vector<8x128xf32> to vector<1x128xf32>
    %132 = vector.extract_strided_slice %1 {offsets = [0, 6], sizes = [16, 1], strides = [1, 1]} : vector<16x8xf32> to vector<16x1xf32>
    %133 = vector.broadcast %131 : vector<1x128xf32> to vector<16x128xf32>
    %134 = vector.broadcast %132 : vector<16x1xf32> to vector<16x128xf32>
    %135 = arith.subf %133, %134 : vector<16x128xf32>
    %136 = vector.extract_strided_slice %2 {offsets = [0, 6], sizes = [16, 1], strides = [1, 1]} : vector<16x8xf32> to vector<16x1xf32>
    %137 = vector.broadcast %136 : vector<16x1xf32> to vector<16x128xf32>
    %138 = arith.mulf %135, %137 : vector<16x128xf32>
    %139 = vector.extract_strided_slice %3 {offsets = [0, 6], sizes = [16, 1], strides = [1, 1]} : vector<16x8xf32> to vector<16x1xf32>
    %140 = vector.broadcast %139 : vector<16x1xf32> to vector<16x128xf32>
    %141 = vector.broadcast %131 : vector<1x128xf32> to vector<16x128xf32>
    %142 = arith.subf %140, %141 : vector<16x128xf32>
    %143 = vector.extract_strided_slice %4 {offsets = [0, 6], sizes = [16, 1], strides = [1, 1]} : vector<16x8xf32> to vector<16x1xf32>
    %144 = vector.broadcast %143 : vector<16x1xf32> to vector<16x128xf32>
    %145 = arith.mulf %142, %144 : vector<16x128xf32>
    %146 = arith.minimumf %138, %145 : vector<16x128xf32>
    %cst_22 = arith.constant 0.000000e+00 : f32
    %cst_23 = arith.constant 1.000000e+00 : f32
    %147 = vector.broadcast %cst_22 : f32 to vector<16x128xf32>
    %148 = arith.maximumf %147, %146 : vector<16x128xf32>
    %149 = vector.broadcast %cst_23 : f32 to vector<16x128xf32>
    %150 = arith.minimumf %149, %148 : vector<16x128xf32>
    %151 = arith.mulf %130, %150 : vector<16x128xf32>
    %152 = vector.extract_strided_slice %0 {offsets = [7, 0], sizes = [1, 128], strides = [1, 1]} : vector<8x128xf32> to vector<1x128xf32>
    %153 = vector.extract_strided_slice %1 {offsets = [0, 7], sizes = [16, 1], strides = [1, 1]} : vector<16x8xf32> to vector<16x1xf32>
    %154 = vector.broadcast %152 : vector<1x128xf32> to vector<16x128xf32>
    %155 = vector.broadcast %153 : vector<16x1xf32> to vector<16x128xf32>
    %156 = arith.subf %154, %155 : vector<16x128xf32>
    %157 = vector.extract_strided_slice %2 {offsets = [0, 7], sizes = [16, 1], strides = [1, 1]} : vector<16x8xf32> to vector<16x1xf32>
    %158 = vector.broadcast %157 : vector<16x1xf32> to vector<16x128xf32>
    %159 = arith.mulf %156, %158 : vector<16x128xf32>
    %160 = vector.extract_strided_slice %3 {offsets = [0, 7], sizes = [16, 1], strides = [1, 1]} : vector<16x8xf32> to vector<16x1xf32>
    %161 = vector.broadcast %160 : vector<16x1xf32> to vector<16x128xf32>
    %162 = vector.broadcast %152 : vector<1x128xf32> to vector<16x128xf32>
    %163 = arith.subf %161, %162 : vector<16x128xf32>
    %164 = vector.extract_strided_slice %4 {offsets = [0, 7], sizes = [16, 1], strides = [1, 1]} : vector<16x8xf32> to vector<16x1xf32>
    %165 = vector.broadcast %164 : vector<16x1xf32> to vector<16x128xf32>
    %166 = arith.mulf %163, %165 : vector<16x128xf32>
    %167 = arith.minimumf %159, %166 : vector<16x128xf32>
    %cst_24 = arith.constant 0.000000e+00 : f32
    %cst_25 = arith.constant 1.000000e+00 : f32
    %168 = vector.broadcast %cst_24 : f32 to vector<16x128xf32>
    %169 = arith.maximumf %168, %167 : vector<16x128xf32>
    %170 = vector.broadcast %cst_25 : f32 to vector<16x128xf32>
    %171 = arith.minimumf %170, %169 : vector<16x128xf32>
    %172 = arith.mulf %151, %171 : vector<16x128xf32>
    %173 = vector.broadcast %5 : vector<16x1xf32> to vector<16x128xf32>
    %174 = arith.mulf %172, %173 : vector<16x128xf32>
    %cst_26 = arith.constant dense<0.000000e+00> : vector<128xf32>
    %175 = vector.multi_reduction <add>, %174, %cst_26 [0] : vector<16x128xf32> to vector<128xf32>
    %176 = vector.shape_cast %175 : vector<128xf32> to vector<1x128xf32>
    %cst_27 = arith.constant dense<0.000000e+00> : vector<128xf32>
    %177 = vector.multi_reduction <add>, %172, %cst_27 [0] : vector<16x128xf32> to vector<128xf32>
    %178 = vector.shape_cast %177 : vector<128xf32> to vector<1x128xf32>
    %cst_28 = arith.constant 9.99999996E-13 : f32
    %179 = vector.broadcast %cst_28 : f32 to vector<1x128xf32>
    %180 = arith.addf %178, %179 : vector<1x128xf32>
    %181 = arith.divf %176, %180 : vector<1x128xf32>
    %c0_29 = arith.constant 0 : index
    %c0_30 = arith.constant 0 : index
    %182 = vector.load %arg7[%c0_29, %c0_30] : memref<1x128xf32, #tpu.memory_space<vmem>>, vector<1x128xf32>
    tpu.vector_store %arg7[%c0_29, %c0_30], %181 {strides = array<i32>} : memref<1x128xf32, #tpu.memory_space<vmem>>, vector<1x128xf32>,
    return
  }
  func.func @transform_0(%arg0: i32) -> (i32, i32) {
    %c0_i32 = arith.constant 0 : i32
    %c0_i32_0 = arith.constant 0 : i32
    return %c0_i32, %arg0 : i32, i32
  }
  func.func @transform_1(%arg0: i32) -> (i32, i32) {
    %c0_i32 = arith.constant 0 : i32
    %c0_i32_0 = arith.constant 0 : i32
    %c0_i32_1 = arith.constant 0 : i32
    return %c0_i32, %c0_i32_0 : i32, i32
  }
  func.func @transform_2(%arg0: i32) -> (i32, i32) {
    %c0_i32 = arith.constant 0 : i32
    %c0_i32_0 = arith.constant 0 : i32
    %c0_i32_1 = arith.constant 0 : i32
    return %c0_i32, %c0_i32_0 : i32, i32
  }
  func.func @transform_3(%arg0: i32) -> (i32, i32) {
    %c0_i32 = arith.constant 0 : i32
    %c0_i32_0 = arith.constant 0 : i32
    %c0_i32_1 = arith.constant 0 : i32
    return %c0_i32, %c0_i32_0 : i32, i32
  }
  func.func @transform_4(%arg0: i32) -> (i32, i32) {
    %c0_i32 = arith.constant 0 : i32
    %c0_i32_0 = arith.constant 0 : i32
    %c0_i32_1 = arith.constant 0 : i32
    return %c0_i32, %c0_i32_0 : i32, i32
  }
  func.func @transform_5(%arg0: i32) -> (i32, i32) {
    %c0_i32 = arith.constant 0 : i32
    %c0_i32_0 = arith.constant 0 : i32
    %c0_i32_1 = arith.constant 0 : i32
    return %c0_i32, %c0_i32_0 : i32, i32
  }
  func.func @transform_6(%arg0: i32) -> (i32, i32) {
    %c0_i32 = arith.constant 0 : i32
    %c0_i32_0 = arith.constant 0 : i32
    return %c0_i32, %arg0 : i32, i32
  }
}

</mosaic_0001>

<bundles_post_ra>
// kernel: tpu_custom_call.1
= control target key start
LH: loop header
LB: loop body
LE: loop exit
PB: predicated region body
PF: predicated region fallthrough
CT: control target
= control target key end

     0   :  { %v554_v2 = vmov 0   ;;  %s756_s0 = inlined_call_operand.vmem [shape: f32[8,128], index: 0, kind: input, shape index: {}]   ;;  %s757_s1 = inlined_call_operand.vmem [shape: f32[16,8], index: 1, kind: input, shape index: {}]   ;;  %s758_s2 = inlined_call_operand.vmem [shape: f32[16,8], index: 2, kind: input, shape index: {}]   ;;  %s759_s3 = inlined_call_operand.vmem [shape: f32[16,8], index: 3, kind: input, shape index: {}]   ;;  %s760_s4 = inlined_call_operand.vmem [shape: f32[16,8], index: 4, kind: input, shape index: {}]   ;;  %s761_s5 = inlined_call_operand.vmem [shape: f32[16,1], index: 5, kind: input, shape index: {}]   ;;  %s762_s6 = inlined_call_operand.hbm [shape: f32[1,128], index: 6, kind: output, shape index: {}]  }
   0x1   :  { %v601_v0 = vld [vmem:[%s758_s2] sm:$0xff]  ;;  %511 = vset.pattern.permute.xlu1 %v554_v2  ;;  %510 = vset.pattern.permute.xlu0 %v554_v2  ;;  %v615_v3 = vld [vmem:[%s758_s2 + $0x8] sm:$0xff] }
   0x2   :  { %v606_v1 = vld [vmem:[%s757_s1] sm:$0xff]  ;;  %53 = vperm.xlu1 %511, %v601_v0   ;;  %v620_v4 = vld [vmem:[%s757_s1 + $0x8] sm:$0xff] }
   0x3   :  { %41 = vperm.xlu0 %510, %v606_v1  }
   0x4   :  { %11 = vsyncpa [#allocation3], 0  ;;  %v627_v5 = vld [vmem:[%s759_s3 + $0x8] sm:$0xff]  ;;  %v632_v6 = vld [vmem:[%s759_s3] sm:$0xff]  ;;  %v555_v9 = vmov 1   ;;  %v556_v10 = vmov 2   ;;  %v35_v16 = vlaneseq }
   0x5   :  { %v639_v7 = vld [vmem:[%s760_s4 + $0x8] sm:$0xff]  ;;  %v644_v8 = vld [vmem:[%s760_s4] sm:$0xff]  ;;  %v557_v11 = vmov 3   ;;  %v558_v12 = vmov 4   ;;  %v559_v13 = vmov 5   ;;  %v560_v14 = vmov 6  }
   0x6   :  { %58 = vperm.xlu1 %511, %v615_v3   ;;  %v561_v15 = vmov 7   ;;  %v696_v17 = vshrl.u32 %v35_v16, 7  ;;  %v704_v19 = vld [vmem:[%s756_s0] sm:$0xff]  ;;  %v34_v20 = vld [vmem:[%s761_s5 + $0x8] sm:$0xff] }
   0x7   :  { %46 = vperm.xlu0 %510, %v620_v4   ;;  %v33_v45 = vld [vmem:[%s761_s5] sm:$0xff]  ;;  %s562_s5 = smov [#allocation2]  }
   0x8   :  { %v37_v18 = vsub.s32 0, %v696_v17  ;;  %v95_v36 = vsub.s32 1, %v696_v17  ;;  %v147_v57 = vsub.s32 2, %v696_v17  ;;  %s493_s14 = sshll.u32 %s562_s5, 4  ;;  %s494_s14 = int_to_ptr.vmem [resolvable:$true] %s493_s14 }
   0x9   :  { %s530_s15 = scalar_lea.vmem %s494_s14, 16  ;;  %s534_s16 = scalar_lea.vmem %s494_s14, 32 }
   0xa   :  { %70 = vperm.xlu1 %511, %v627_v5   ;;  %v38_v21 = vrot.slane %v704_v19, %v37_v18  ;;  %v96_v41 = vrot.slane %v704_v19, %v95_v36  ;;  %p531_p0 = scmp.ne.s32.totalorder %s494_s14, %s530_s15  ;;  %p535_p1 = scmp.lt.s32.totalorder %s494_s14, %s494_s14 }
   0xb   :  { %65 = vperm.xlu0 %510, %v632_v6   ;;  %p536_p2 = scmp.lt.s32.totalorder %s534_s16, %s530_s15 }
   0xd   :  { %p537_p3 = por %p536_p2, %p535_p1 }
   0xe   :  { %82 = vperm.xlu1 %511, %v639_v7  }
   0xf   :  { %77 = vperm.xlu0 %510, %v644_v8   ;;  %p538_p4 = pnand %p537_p3, %p531_p0 }
  0x12   :  { %513 = vset.pattern.permute.xlu1 %v555_v9 }
  0x13   :  { %512 = vset.pattern.permute.xlu0 %v555_v9  ;;  %102 = vperm.xlu1 %513, %v620_v4  }
  0x14   :  { %98 = vperm.xlu0 %512, %v606_v1  }
  0x17   :  { %108 = vperm.xlu1 %513, %v601_v0  }
  0x18   :  { %112 = vperm.xlu0 %512, %v615_v3  }
  0x1b   :  { %118 = vperm.xlu1 %513, %v632_v6  }
  0x1c   :  { %122 = vperm.xlu0 %512, %v627_v5  }
  0x1f   :  { %128 = vperm.xlu1 %513, %v644_v8  }
  0x20   :  { %132 = vperm.xlu0 %512, %v639_v7  }
  0x23   :  { %514 = vset.pattern.permute.xlu1 %v556_v10 }
  0x24   :  { %515 = vset.pattern.permute.xlu0 %v556_v10  ;;  %150 = vperm.xlu1 %514, %v606_v1  }
  0x25   :  { %154 = vperm.xlu0 %515, %v620_v4  }
  0x28   :  { %160 = vperm.xlu1 %514, %v601_v0  }
  0x29   :  { %170 = vperm.xlu0 %515, %v632_v6  }
  0x2c   :  { %164 = vperm.xlu1 %514, %v615_v3  }
  0x2d   :  { %180 = vperm.xlu0 %515, %v644_v8  }
  0x30   :  { %174 = vperm.xlu1 %514, %v627_v5  }
  0x31   :  { %516 = vset.pattern.permute.xlu0 %v557_v11 }
  0x32   :  { %202 = vperm.xlu0 %516, %v606_v1  }
  0x34   :  { %184 = vperm.xlu1 %514, %v639_v7  }
  0x36   :  { %216 = vperm.xlu0 %516, %v615_v3  }
  0x38   :  { %517 = vset.pattern.permute.xlu1 %v557_v11 }
  0x39   :  { %206 = vperm.xlu1 %517, %v620_v4  }
  0x3a   :  { %226 = vperm.xlu0 %516, %v627_v5  }
  0x3d   :  { %212 = vperm.xlu1 %517, %v601_v0  }
  0x3e   :  { %236 = vperm.xlu0 %516, %v639_v7  }
  0x41   :  { %222 = vperm.xlu1 %517, %v632_v6  }
  0x42   :  { %519 = vset.pattern.permute.xlu0 %v558_v12 }
  0x43   :  { %258 = vperm.xlu0 %519, %v620_v4  }
  0x45   :  { %232 = vperm.xlu1 %517, %v644_v8  }
  0x47   :  { %274 = vperm.xlu0 %519, %v632_v6  }
  0x49   :  { %518 = vset.pattern.permute.xlu1 %v558_v12 }
  0x4a   :  { %254 = vperm.xlu1 %518, %v606_v1  }
  0x4b   :  { %284 = vperm.xlu0 %519, %v644_v8  }
  0x4e   :  { %264 = vperm.xlu1 %518, %v601_v0  }
  0x4f   :  { %520 = vset.pattern.permute.xlu0 %v559_v13 }
  0x50   :  { %306 = vperm.xlu0 %520, %v606_v1  }
  0x52   :  { %268 = vperm.xlu1 %518, %v615_v3  }
  0x54   :  { %330 = vperm.xlu0 %520, %v627_v5  }
  0x56   :  { %278 = vperm.xlu1 %518, %v627_v5  }
  0x58   :  { %320 = vperm.xlu0 %520, %v615_v3  }
  0x5a   :  { %288 = vperm.xlu1 %518, %v639_v7  }
  0x5c   :  { %340 = vperm.xlu0 %520, %v639_v7  }
  0x5e   :  { %521 = vset.pattern.permute.xlu1 %v559_v13 }
  0x5f   :  { %310 = vperm.xlu1 %521, %v620_v4  }
  0x60   :  { %523 = vset.pattern.permute.xlu0 %v560_v14 }
  0x61   :  { %362 = vperm.xlu0 %523, %v620_v4  }
  0x63   :  { %326 = vperm.xlu1 %521, %v632_v6  }
  0x65   :  { %368 = vperm.xlu0 %523, %v601_v0  }
  0x67   :  { %316 = vperm.xlu1 %521, %v601_v0  }
  0x69   :  { %388 = vperm.xlu0 %523, %v644_v8  }
  0x6b   :  { %336 = vperm.xlu1 %521, %v644_v8  }
  0x6d   :  { %524 = vset.pattern.permute.xlu0 %v561_v15 }
  0x6e   :  { %410 = vperm.xlu0 %524, %v606_v1  }
  0x6f   :  { %522 = vset.pattern.permute.xlu1 %v560_v14 }
  0x70   :  { %358 = vperm.xlu1 %522, %v606_v1  }
  0x72   :  { %434 = vperm.xlu0 %524, %v627_v5  }
  0x74   :  { %378 = vperm.xlu1 %522, %v632_v6  }
  0x76   :  { %424 = vperm.xlu0 %524, %v615_v3  }
  0x78   :  { %382 = vperm.xlu1 %522, %v627_v5  }
  0x7a   :  { %444 = vperm.xlu0 %524, %v639_v7  }
  0x7c   :  { %372 = vperm.xlu1 %522, %v615_v3  }
  0x7e   :  { %527 = vset.pattern.permute.xlu0 %v554_v2 }
  0x7f   :  { %464 = vperm.xlu0 %527, %v34_v20  }
  0x80   :  { %392 = vperm.xlu1 %522, %v639_v7  }
  0x81   :  { %v54_v22 = vpop.permute.xlu1 %53 }
  0x82   :  { %v42_v23 = vpop.permute.xlu0 %41 }
  0x83   :  { %v49_v24 = vsub.f32 %v38_v21, %v42_v23 }
  0x84   :  { %525 = vset.pattern.permute.xlu1 %v561_v15 }
  0x85   :  { %v61_v25 = vmul.f32 %v54_v22, %v49_v24  ;;  %v59_v26 = vpop.permute.xlu1 %58  ;;  %414 = vperm.xlu1 %525, %v620_v4  }
  0x86   :  { %v47_v27 = vpop.permute.xlu0 %46 }
  0x87   :  { %v50_v28 = vsub.f32 %v38_v21, %v47_v27  ;;  %v199_v27 = vsub.s32 3, %v696_v17 }
  0x89   :  { %v62_v29 = vmul.f32 %v59_v26, %v50_v28  ;;  %v71_v30 = vpop.permute.xlu1 %70  ;;  %430 = vperm.xlu1 %525, %v632_v6  }
  0x8a   :  { %v66_v31 = vpop.permute.xlu0 %65  ;;  %v74_v33 = vsub.f32 %v71_v30, %v38_v21 }
  0x8b   :  { %v73_v32 = vsub.f32 %v66_v31, %v38_v21 }
  0x8d   :  { %v83_v34 = vpop.permute.xlu1 %82  ;;  %420 = vperm.xlu1 %525, %v601_v0   ;;  %v148_v0 = vrot.slane %v704_v19, %v147_v57 }
  0x8e   :  { %v78_v35 = vpop.permute.xlu0 %77  ;;  %v86_v37 = vmul.f32 %v83_v34, %v74_v33  ;;  %v200_v34 = vrot.slane %v704_v19, %v199_v27 }
  0x8f   :  { %v85_v38 = vmul.f32 %v78_v35, %v73_v32 }
  0x90   :  { %v88_v39 = vmin.f32 %v62_v29, %v86_v37 }
  0x91   :  { %v87_v40 = vmin.f32 %v61_v25, %v85_v38  ;;  %440 = vperm.xlu1 %525, %v644_v8  }
  0x92   :  { %v103_v42 = vpop.permute.xlu1 %102  ;;  %v90_v60 = vmax.f32 %v88_v39, 0.0 }
  0x93   :  { %v99_v43 = vpop.permute.xlu0 %98  ;;  %v106_v46 = vsub.f32 %v96_v41, %v103_v42  ;;  %v89_v61 = vmax.f32 %v87_v40, 0.0 }
  0x94   :  { %v105_v44 = vsub.f32 %v96_v41, %v99_v43  ;;  %v92_v5 = vmin.f32 %v90_v60, 1.0 }
  0x95   :  { %526 = vset.pattern.permute.xlu1 %v554_v2  ;;  %v91_v6 = vmin.f32 %v89_v61, 1.0 }
  0x96   :  { %v109_v47 = vpop.permute.xlu1 %108  ;;  %459 = vperm.xlu1 %526, %v33_v45  }
  0x97   :  { %v113_v48 = vpop.permute.xlu0 %112  ;;  %v115_v49 = vmul.f32 %v109_v47, %v105_v44 }
  0x98   :  { %v116_v50 = vmul.f32 %v113_v48, %v106_v46 }
  0x9a   :  { %v119_v51 = vpop.permute.xlu1 %118 }
  0x9b   :  { %v123_v52 = vpop.permute.xlu0 %122  ;;  %v125_v54 = vsub.f32 %v119_v51, %v96_v41 }
  0x9c   :  { %v126_v53 = vsub.f32 %v123_v52, %v96_v41 }
  0x9e   :  { %v129_v55 = vpop.permute.xlu1 %128 }
  0x9f   :  { %v133_v56 = vpop.permute.xlu0 %132  ;;  %v135_v58 = vmul.f32 %v129_v55, %v125_v54 }
  0xa0   :  { %v136_v59 = vmul.f32 %v133_v56, %v126_v53 }
  0xa1   :  { %v137_v62 = vmin.f32 %v115_v49, %v135_v58 }
  0xa2   :  { %v138_v63 = vmin.f32 %v116_v50, %v136_v59 }
  0xa3   :  { %v139_v1 = vmax.f32 %v137_v62, 0.0  ;;  %v151_v3 = vpop.permute.xlu1 %150 }
  0xa4   :  { %v140_v2 = vmax.f32 %v138_v63, 0.0  ;;  %v155_v4 = vpop.permute.xlu0 %154  ;;  %v157_v9 = vsub.f32 %v148_v0, %v151_v3 }
  0xa5   :  { %v141_v7 = vmin.f32 %v139_v1, 1.0  ;;  %v158_v14 = vsub.f32 %v148_v0, %v155_v4 }
  0xa6   :  { %v142_v8 = vmin.f32 %v140_v2, 1.0 }
  0xa7   :  { %v143_v10 = vmul.f32 %v141_v7, %v91_v6  ;;  %v161_v12 = vpop.permute.xlu1 %160 }
  0xa8   :  { %v144_v11 = vmul.f32 %v142_v8, %v92_v5  ;;  %v171_v13 = vpop.permute.xlu0 %170  ;;  %v167_v15 = vmul.f32 %v161_v12, %v157_v9 }
  0xa9   :  { %v177_v16 = vsub.f32 %v171_v13, %v148_v0 }
  0xab   :  { %v165_v18 = vpop.permute.xlu1 %164 }
  0xac   :  { %v181_v20 = vpop.permute.xlu0 %180  ;;  %v168_v21 = vmul.f32 %v165_v18, %v158_v14 }
  0xad   :  { %v187_v22 = vmul.f32 %v181_v20, %v177_v16 }
  0xaf   :  { %v189_v23 = vmin.f32 %v167_v15, %v187_v22  ;;  %v175_v24 = vpop.permute.xlu1 %174  ;;  %v251_v22 = vsub.s32 4, %v696_v17 }
  0xb0   :  { %v178_v29 = vsub.f32 %v175_v24, %v148_v0 }
  0xb1   :  { %v191_v25 = vmax.f32 %v189_v23, 0.0  ;;  %v203_v26 = vpop.permute.xlu0 %202 }
  0xb2   :  { %v209_v49 = vsub.f32 %v200_v34, %v203_v26  ;;  %v252_v26 = vrot.slane %v704_v19, %v251_v22 }
  0xb3   :  { %v193_v28 = vmin.f32 %v191_v25, 1.0  ;;  %v185_v30 = vpop.permute.xlu1 %184 }
  0xb4   :  { %v188_v32 = vmul.f32 %v185_v30, %v178_v29  ;;  %v355_v29 = vsub.s32 6, %v696_v17  ;;  %v407_v30 = vsub.s32 7, %v696_v17 }
  0xb5   :  { %v195_v31 = vmul.f32 %v193_v28, %v143_v10  ;;  %v217_v33 = vpop.permute.xlu0 %216 }
  0xb6   :  { %v190_v35 = vmin.f32 %v168_v21, %v188_v32  ;;  %v303_v21 = vsub.s32 5, %v696_v17 }
  0xb8   :  { %v192_v36 = vmax.f32 %v190_v35, 0.0  ;;  %v207_v37 = vpop.permute.xlu1 %206  ;;  %v304_v24 = vrot.slane %v704_v19, %v303_v21 }
  0xb9   :  { %v227_v38 = vpop.permute.xlu0 %226  ;;  %v210_v39 = vsub.f32 %v200_v34, %v207_v37 }
  0xba   :  { %v230_v40 = vsub.f32 %v227_v38, %v200_v34  ;;  %v194_v41 = vmin.f32 %v192_v36, 1.0 }
  0xbb   :  { %v220_v45 = vmul.f32 %v217_v33, %v210_v39 }
  0xbc   :  { %v196_v42 = vmul.f32 %v194_v41, %v144_v11  ;;  %v213_v43 = vpop.permute.xlu1 %212  ;;  %v356_v41 = vrot.slane %v704_v19, %v355_v29 }
  0xbd   :  { %v237_v44 = vpop.permute.xlu0 %236  ;;  %v219_v55 = vmul.f32 %v213_v43, %v209_v49 }
  0xbe   :  { %v240_v46 = vmul.f32 %v237_v44, %v230_v40 }
  0xc0   :  { %v242_v47 = vmin.f32 %v220_v45, %v240_v46  ;;  %v223_v48 = vpop.permute.xlu1 %222 }
  0xc1   :  { %v229_v53 = vsub.f32 %v223_v48, %v200_v34 }
  0xc2   :  { %v244_v50 = vmax.f32 %v242_v47, 0.0  ;;  %v259_v51 = vpop.permute.xlu0 %258 }
  0xc4   :  { %v246_v52 = vmin.f32 %v244_v50, 1.0  ;;  %v233_v54 = vpop.permute.xlu1 %232 }
  0xc5   :  { %v239_v57 = vmul.f32 %v233_v54, %v229_v53 }
  0xc6   :  { %v727_v56 = vmul.f32 %v246_v52, %v196_v42  ;;  %v275_v58 = vpop.permute.xlu0 %274  ;;  %v408_v42 = vrot.slane %v704_v19, %v407_v30 }
  0xc7   :  { %v241_v59 = vmin.f32 %v219_v55, %v239_v57  ;;  %v281_v28 = vsub.f32 %v275_v58, %v252_v26 }
  0xc9   :  { %v243_v60 = vmax.f32 %v241_v59, 0.0  ;;  %v255_v61 = vpop.permute.xlu1 %254 }
  0xca   :  { %v285_v62 = vpop.permute.xlu0 %284  ;;  %v261_v35 = vsub.f32 %v252_v26, %v255_v61 }
  0xcb   :  { %v245_v63 = vmin.f32 %v243_v60, 1.0  ;;  %v291_v40 = vmul.f32 %v285_v62, %v281_v28 }
  0xcd   :  { %v729_v0 = vmul.f32 %v245_v63, %v195_v31  ;;  %v265_v1 = vpop.permute.xlu1 %264  ;;  %v262_v31 = vsub.f32 %v252_v26, %v259_v51 }
  0xce   :  { %v271_v39 = vmul.f32 %v265_v1, %v261_v35 }
  0xcf   :  { %v307_v2 = vpop.permute.xlu0 %306 }
  0xd0   :  { %v313_v47 = vsub.f32 %v304_v24, %v307_v2  ;;  %v293_v58 = vmin.f32 %v271_v39, %v291_v40 }
  0xd1   :  { %v269_v3 = vpop.permute.xlu1 %268 }
  0xd2   :  { %v272_v43 = vmul.f32 %v269_v3, %v262_v31 }
  0xd3   :  { %v331_v4 = vpop.permute.xlu0 %330 }
  0xd4   :  { %v334_v33 = vsub.f32 %v331_v4, %v304_v24 }
  0xd5   :  { %v279_v5 = vpop.permute.xlu1 %278 }
  0xd6   :  { %v282_v32 = vsub.f32 %v279_v5, %v252_v26 }
  0xd7   :  { %v321_v6 = vpop.permute.xlu0 %320 }
  0xd9   :  { %v289_v7 = vpop.permute.xlu1 %288 }
  0xda   :  { %v292_v37 = vmul.f32 %v289_v7, %v282_v32  ;;  %v295_v7 = vmax.f32 %v293_v58, 0.0 }
  0xdb   :  { %v341_v9 = vpop.permute.xlu0 %340 }
  0xdc   :  { %v344_v45 = vmul.f32 %v341_v9, %v334_v33  ;;  %v294_v49 = vmin.f32 %v272_v43, %v292_v37  ;;  %v297_v21 = vmin.f32 %v295_v7, 1.0 }
  0xde   :  { %v311_v8 = vpop.permute.xlu1 %310  ;;  %v296_v1 = vmax.f32 %v294_v49, 0.0  ;;  %v299_v30 = vmul.f32 %v297_v21, %v729_v0 }
  0xdf   :  { %v314_v34 = vsub.f32 %v304_v24, %v311_v8 }
  0xe0   :  { %v363_v11 = vpop.permute.xlu0 %362 }
  0xe1   :  { %v324_v44 = vmul.f32 %v321_v6, %v314_v34  ;;  %v366_v51 = vsub.f32 %v356_v41, %v363_v11  ;;  %v298_v11 = vmin.f32 %v296_v1, 1.0 }
  0xe2   :  { %v327_v10 = vpop.permute.xlu1 %326 }
  0xe3   :  { %v333_v46 = vsub.f32 %v327_v10, %v304_v24  ;;  %v346_v59 = vmin.f32 %v324_v44, %v344_v45 }
  0xe4   :  { %v369_v13 = vpop.permute.xlu0 %368 }
  0xe5   :  { %v348_v8 = vmax.f32 %v346_v59, 0.0 }
  0xe6   :  { %v317_v12 = vpop.permute.xlu1 %316 }
  0xe7   :  { %v323_v61 = vmul.f32 %v317_v12, %v313_v47  ;;  %v350_v22 = vmin.f32 %v348_v8, 1.0 }
  0xe8   :  { %v389_v15 = vpop.permute.xlu0 %388 }
  0xea   :  { %v337_v14 = vpop.permute.xlu1 %336 }
  0xeb   :  { %v343_v50 = vmul.f32 %v337_v14, %v333_v46 }
  0xed   :  { %v731_v20 = vpop.permute.xlu0 %410  ;;  %v345_v2 = vmin.f32 %v323_v61, %v343_v50 }
  0xef   :  { %v359_v16 = vpop.permute.xlu1 %358 }
  0xf0   :  { %v365_v53 = vsub.f32 %v356_v41, %v359_v16  ;;  %v347_v16 = vmax.f32 %v345_v2, 0.0 }
  0xf1   :  { %v435_v25 = vpop.permute.xlu0 %434 }
  0xf2   :  { %v438_v54 = vsub.f32 %v435_v25, %v408_v42  ;;  %v375_v4 = vmul.f32 %v369_v13, %v365_v53  ;;  %v300_v25 = vmul.f32 %v298_v11, %v727_v56  ;;  %v349_v26 = vmin.f32 %v347_v16, 1.0 }
  0xf3   :  { %v379_v18 = vpop.permute.xlu1 %378 }
  0xf4   :  { %v385_v17 = vsub.f32 %v379_v18, %v356_v41  ;;  %v352_v31 = vmul.f32 %v350_v22, %v300_v25  ;;  %v351_v35 = vmul.f32 %v349_v26, %v299_v30 }
  0xf5   :  { %v425_v38 = vpop.permute.xlu0 %424 }
  0xf6   :  { %v395_v19 = vmul.f32 %v389_v15, %v385_v17  ;;  %v417_v15 = vsub.f32 %v408_v42, %v731_v20 }
  0xf7   :  { %v383_v23 = vpop.permute.xlu1 %382 }
  0xf8   :  { %v386_v48 = vsub.f32 %v383_v23, %v356_v41  ;;  %v397_v9 = vmin.f32 %v375_v4, %v395_v19 }
  0xf9   :  { %v445_v60 = vpop.permute.xlu0 %444 }
  0xfa   :  { %v448_v6 = vmul.f32 %v445_v60, %v438_v54  ;;  %v399_v12 = vmax.f32 %v397_v9, 0.0 }
  0xfb   :  { %v373_v27 = vpop.permute.xlu1 %372 }
  0xfc   :  { %v376_v62 = vmul.f32 %v373_v27, %v366_v51  ;;  %v401_v32 = vmin.f32 %v399_v12, 1.0 }
  0xfe   :  { %v403_v39 = vmul.f32 %v401_v32, %v351_v35  ;;  %v465_v40 = vpop.permute.xlu0 %464 }
  0xff   :  { %v393_v36 = vpop.permute.xlu1 %392 }
 0x100   :  { %v396_v55 = vmul.f32 %v393_v36, %v386_v48 }
 0x102   :  { %v398_v5 = vmin.f32 %v376_v62, %v396_v55 }
 0x104   :  { %v415_v52 = vpop.permute.xlu1 %414  ;;  %v400_v18 = vmax.f32 %v398_v5, 0.0 }
 0x105   :  { %v418_v57 = vsub.f32 %v408_v42, %v415_v52 }
 0x106   :  { %v402_v27 = vmin.f32 %v400_v18, 1.0 }
 0x107   :  { %v428_v63 = vmul.f32 %v425_v38, %v418_v57 }
 0x108   :  { %v431_v3 = vpop.permute.xlu1 %430  ;;  %v404_v37 = vmul.f32 %v402_v27, %v352_v31 }
 0x109   :  { %v450_v10 = vmin.f32 %v428_v63, %v448_v6  ;;  %v437_v24 = vsub.f32 %v431_v3, %v408_v42 }
 0x10b   :  { %v452_v23 = vmax.f32 %v450_v10, 0.0 }
 0x10c   :  { %v421_v14 = vpop.permute.xlu1 %420 }
 0x10d   :  { %v427_v28 = vmul.f32 %v421_v14, %v417_v15  ;;  %v454_v33 = vmin.f32 %v452_v23, 1.0 }
 0x10f   :  { %v456_v20 = vmul.f32 %v454_v33, %v404_v37 }
 0x110   :  { %v441_v13 = vpop.permute.xlu1 %440 }
 0x111   :  { %v447_v29 = vmul.f32 %v441_v13, %v437_v24  ;;  %v468_v42 = vmul.f32 %v465_v40, %v456_v20 }
 0x113   :  { %v449_v34 = vmin.f32 %v427_v28, %v447_v29 }
 0x115   :  { %v451_v36 = vmax.f32 %v449_v34, 0.0  ;;  %v460_v41 = vpop.permute.xlu1 %459 }
 0x117   :  { %v453_v38 = vmin.f32 %v451_v36, 1.0 }
 0x119   :  { %v455_v56 = vmul.f32 %v453_v38, %v403_v39 }
 0x11b   :  { %v467_v43 = vmul.f32 %v460_v41, %v455_v56  ;;  %v476_v44 = vadd.f32 %v456_v20, %v455_v56 }
 0x11d   :  { %v469_v45 = vadd.f32 %v468_v42, %v467_v43  ;;  %v477_v46 = vrot.slane %v476_v44, 4 }
 0x11f   :  { %v478_v47 = vadd.f32 %v477_v46, %v476_v44  ;;  %v470_v0 = vrot.slane %v469_v45, 4 }
 0x121   :  { %v479_v17 = vrot.slane %v478_v47, 2  ;;  %v471_v49 = vadd.f32 %v470_v0, %v469_v45 }
 0x123   :  { %v480_v48 = vadd.f32 %v479_v17, %v478_v47  ;;  %v472_v52 = vrot.slane %v471_v49, 2 }
 0x125   :  { %v481_v50 = vrot.slane %v480_v48, 1  ;;  %v473_v54 = vadd.f32 %v472_v52, %v471_v49 }
 0x127   :  { %v482_v51 = vadd.f32 %v481_v50, %v480_v48  ;;  %v474_v55 = vrot.slane %v473_v54, 1 }
 0x129   :  { %v483_v53 = vadd.f32 1e-12, %v482_v51  ;;  %v475_v57 = vadd.f32 %v474_v55, %v473_v54 }
 0x12b   :  { %528 = vrcp.f32 %v483_v53 }
 0x135   :  { %v529_v58 = vpop.eup %528 }
 0x136   :  { %v485_v59 = vmul.f32 %v529_v58, %v475_v57 }
 0x138   :  { %486 = vst [vmem:[#allocation2] sm:$0x1] %v485_v59 }
 0x139   :  { %541 = shalt.err (!%p538_p4)
}
 0x13a   :  { %s542_s19 = scalar_lea.hbm %s762_s6, 16 }
 0x13b   :  { %p543_p5 = scmp.ne.s32.totalorder %s762_s6, %s542_s19  ;;  %p546_p6 = scmp.lt.u32.totalorder %s542_s19, %s762_s6 }
 0x13d   :  { %p548_p7 = pnand %p546_p6, %p543_p5 }
 0x13f   :  { %551 = shalt.err (!%p548_p7)
}
 0x140   :  { %496 = dma.vmem_to_hbm [thread:$0]  %s494_s14, 16, %s762_s6, [#allocation3]  }
 0x141   :  { %552 = dma.done.wait [#allocation3], 16  }
 0x142   :  { %553 = vsyncadd [#allocation3], 4294967280 }
 0x143   :  { %500 = vsyncpa [#allocation3], 1 }

</bundles_post_ra>
